<compile_context>
chip_gen: v5e
topology: v5e:2x2
jax: 0.10.0
libtpu: 0.0.40
codegen_flags: <defaults>
</compile_context>

<pallas_src>
import numpy as np
import jax
import jax.numpy as jnp
from jax import lax
from jax.experimental import pallas as pl
from jax.experimental.pallas import tpu as pltpu

# ---------------------------------------------------------------------------
# problem sizes (module defaults: k=3, kernel_size=3, stride=2, depth=1)
# ---------------------------------------------------------------------------
B, C_IN, C_OUT, H, W = 2, 4, 8, 16, 16
K = 3                                   # depthwise kernel size
UP_K, UP_S = 3, 2                       # up conv_block kernel / stride
EPS = 1e-5
H_OUT = (H + 2 * 1 - UP_K) // UP_S + 1  # 8
W_OUT = (W + 2 * 1 - UP_K) // UP_S + 1  # 8
C_HID = 4 * C_IN
P = H * W                               # 256 pixels -> lane dimension
Q = H_OUT * W_OUT                       # 64 output pixels
NTAP = K * K


def _pick_b_tile():
    # Dual-TensorCore (megacore) chips: one batch element per grid step so the
    # "parallel" batch axis shards across both cores.  Single-TC chips
    # (v5e/v6e): fuse the whole batch into one sublane-stacked grid step
    # (saves the ~0.35us per-step overhead and fills all 8 f32 sublanes).
    try:
        kind = jax.devices()[0].device_kind.lower()
    except Exception:
        kind = ""
    if "v7" in kind or "7x" in kind or "v4" in kind:
        return 1
    return B


B_TILE = _pick_b_tile()
NB = B // B_TILE
BC_IN = B_TILE * C_IN
BC_HID = B_TILE * C_HID
BC_OUT = B_TILE * C_OUT

# packed per-channel parameter vector: static row offsets
_OFF_BDW = 0
_OFF_SDW = _OFF_BDW + BC_IN
_OFF_TDW = _OFF_SDW + BC_IN
_OFF_B1 = _OFF_TDW + BC_IN
_OFF_B2 = _OFF_B1 + BC_HID
_OFF_S2 = _OFF_B2 + BC_IN
_OFF_T2 = _OFF_S2 + BC_IN
_OFF_BUP = _OFF_T2 + BC_IN
PVEC_LEN = _OFF_BUP + BC_OUT

_SQRT_2_OVER_PI = 0.7978845608028654


def _gelu(x):
    # tanh-form GELU (transcendental lands on the otherwise idle EUP).
    return 0.5 * x * (1.0 + jnp.tanh(_SQRT_2_OVER_PI * (x + 0.044715 * x * x * x)))


# ---------------------------------------------------------------------------
# the fused kernel (one grid step == B_TILE batch elements, sublane-stacked)
# activations are channel-major: (BC, P) with P = H*W pixels in the lane dim
# ---------------------------------------------------------------------------
def cmunext_fused_kernel(x_ref, wdw_ref, masks_ref, w1_ref, w2_ref,
                         wup_ref, dsel_ref, pvec_ref, o_ref, taps_ref):
    x = x_ref[0]                                   # (BC_IN, P)
    wdw = wdw_ref[...]                             # (BC_IN, 9)
    masks = masks_ref[...]                         # (9, P)  0/1 validity per tap

    pv = pvec_ref[...]                             # packed per-channel params
    b_dw = pv[_OFF_BDW:_OFF_BDW + BC_IN]
    s_dw = pv[_OFF_SDW:_OFF_SDW + BC_IN]
    t_dw = pv[_OFF_TDW:_OFF_TDW + BC_IN]
    b1 = pv[_OFF_B1:_OFF_B1 + BC_HID]
    b2 = pv[_OFF_B2:_OFF_B2 + BC_IN]
    s2 = pv[_OFF_S2:_OFF_S2 + BC_IN]
    t2 = pv[_OFF_T2:_OFF_T2 + BC_IN]
    b_up = pv[_OFF_BUP:_OFF_BUP + BC_OUT]

    # ---- depthwise 3x3 conv: XLU lane rolls + host-precomputed edge masks ----
    acc = x * wdw[:, 4:5]                          # center tap: no shift/mask
    for kh in range(K):
        for kw in range(K):
            if kh == 1 and kw == 1:
                continue
            dr, dc = kh - 1, kw - 1
            sh = (-(dr * W + dc)) % P              # static positive lane roll
            t = kh * K + kw
            v = pltpu.roll(x, shift=sh, axis=1)    # v[:, p] == x[:, p + dr*W + dc]
            acc = acc + v * (wdw[:, t:t + 1] * masks[t:t + 1, :])

    # bias -> GELU -> BN_dw (explicit: residual add prevents folding) -> residual
    r = _gelu(acc + b_dw) * s_dw + t_dw + x                                  # (BC_IN, P)

    # ---- 1x1 expand -> GELU -> [BN1 folded into w2/b2] -> 1x1 project -> GELU -> BN3 ----
    h = _gelu(jnp.dot(w1_ref[...], r, preferred_element_type=jnp.float32) + b1)   # (BC_HID, P)
    m = _gelu(jnp.dot(w2_ref[...], h, preferred_element_type=jnp.float32) + b2)   # (BC_IN, P)
    m = m * s2 + t2                     # BN3 explicit (zero padding of up-conv below)

    # ---- up conv_block: 3x3 stride-2 conv (BN_up folded) + ReLU ----
    # build 9 rolled+masked taps of m at full resolution, stack on sublanes,
    # one MXU matmul with the tap-stacked weights, one (P,Q) stride-2 down-select.
    for kh in range(UP_K):
        for kw in range(UP_K):
            dr, dc = kh - 1, kw - 1
            t = kh * UP_K + kw
            if dr == 0 and dc == 0:
                tap = m
            else:
                sh = (-(dr * W + dc)) % P
                tap = pltpu.roll(m, shift=sh, axis=1) * masks[t:t + 1, :]
            taps_ref[t * BC_IN:(t + 1) * BC_IN, :] = tap

    u_full = jnp.dot(wup_ref[...], taps_ref[...],
                     preferred_element_type=jnp.float32)                     # (BC_OUT, P)
    u = jnp.dot(u_full, dsel_ref[...], preferred_element_type=jnp.float32)   # (BC_OUT, Q)
    o_ref[0] = jnp.maximum(u + b_up, 0.0)


# ---------------------------------------------------------------------------
# wrapper: NCHW in, NCHW out; spatial dims flattened into the lane axis
# ---------------------------------------------------------------------------
def _const_spec(arr):
    n = arr.ndim
    return pl.BlockSpec(arr.shape, lambda i, _n=n: (0,) * _n)


def cmunext_block(x_nchw, kp):
    xf = x_nchw.reshape(NB, BC_IN, P)              # free reshape (no transpose)
    in_arrs = (xf, kp['w_dw'], kp['masks'], kp['w1'], kp['w2'],
               kp['w_up'], kp['dsel'], kp['pvec'])

    flops = B * (2 * NTAP * C_IN * P           # depthwise 3x3
                 + 2 * C_HID * C_IN * P        # 1x1 expand
                 + 2 * C_IN * C_HID * P        # 1x1 project
                 + 2 * C_OUT * NTAP * C_IN * P # up-conv tap matmul
                 + 2 * C_OUT * P * Q)          # stride-2 down-select
    transcendentals = B * P * (C_IN + C_HID + C_IN)
    bytes_accessed = sum(int(a.size) * 4 for a in in_arrs) + NB * BC_OUT * Q * 4

    out = pl.pallas_call(
        cmunext_fused_kernel,
        out_shape=jax.ShapeDtypeStruct((NB, BC_OUT, Q), jnp.float32),
        grid=(NB,),
        in_specs=[
            pl.BlockSpec((1, BC_IN, P), lambda i: (i, 0, 0)),
            _const_spec(kp['w_dw']), _const_spec(kp['masks']),
            _const_spec(kp['w1']), _const_spec(kp['w2']),
            _const_spec(kp['w_up']), _const_spec(kp['dsel']),
            _const_spec(kp['pvec']),
        ],
        out_specs=pl.BlockSpec((1, BC_OUT, Q), lambda i: (i, 0, 0)),
        scratch_shapes=[pltpu.VMEM((NTAP * BC_IN, P), jnp.float32)],
        compiler_params=pltpu.CompilerParams(
            dimension_semantics=("parallel",),
            vmem_limit_bytes=8 * 1024 * 1024),
        cost_estimate=pl.CostEstimate(flops=flops,
                                      transcendentals=transcendentals,
                                      bytes_accessed=bytes_accessed),
    )(*in_arrs)
    return out.reshape(B, C_OUT, H_OUT, W_OUT)


# ---------------------------------------------------------------------------
# host-side precompute: 0/1 edge masks, stride-2 down-select, BN folds,
# batch tiling / block-diagonal weights, packed per-channel parameter vector
# ---------------------------------------------------------------------------
def _build_masks():
    msk = np.zeros((NTAP, P), np.float32)
    for kh in range(K):
        for kw in range(K):
            dr, dc = kh - 1, kw - 1
            t = kh * K + kw
            for r in range(H):
                for c in range(W):
                    if 0 <= r + dr < H and 0 <= c + dc < W:
                        msk[t, r * W + c] = 1.0
    return jnp.asarray(msk)


def _build_downselect():
    d = np.zeros((P, Q), np.float32)
    for ho in range(H_OUT):
        for wo in range(W_OUT):
            d[(UP_S * ho) * W + UP_S * wo, ho * W_OUT + wo] = 1.0
    return jnp.asarray(d)


def prepare_kernel_params(p):
    kp = {}
    eye = jnp.eye(B_TILE, dtype=jnp.float32)

    # depthwise conv: (K,K,C_IN) -> (C_IN, 9), tap-major t = kh*3+kw, batch-tiled
    w_dw = jnp.transpose(p['w_dw'], (2, 0, 1)).reshape(C_IN, NTAP)
    kp['w_dw'] = jnp.tile(w_dw, (B_TILE, 1))
    kp['masks'] = _build_masks()

    # 1x1 expand (block-diagonal over the fused batch)
    kp['w1'] = jnp.kron(eye, p['w1'].T)                       # (BC_HID, BC_IN)
    # 1x1 project with BN1 folded in
    w2f = p['w2'].T * p['s1'][None, :]                        # (C_IN, C_HID)
    b2f = p['b2'] + p['w2'].T @ p['t1']                       # (C_IN,)
    kp['w2'] = jnp.kron(eye, w2f)                             # (BC_IN, BC_HID)

    # up conv: (K,K,C_IN,C_OUT) -> per-tap (C_OUT,C_IN), BN_up scale folded,
    # batch block-diag per tap, concatenated tap-major along the input axis
    w_up_tap = (jnp.transpose(p['w_up'], (0, 1, 3, 2)).reshape(NTAP, C_OUT, C_IN)
                * p['s_up'][None, :, None])
    kp['w_up'] = jnp.concatenate(
        [jnp.kron(eye, w_up_tap[t]) for t in range(NTAP)], axis=1)  # (BC_OUT, 9*BC_IN)
    kp['dsel'] = _build_downselect()                                 # (P, Q)

    # packed per-channel parameter vector (one DMA instead of ~10)
    b_upf = p['b_up'] * p['s_up'] + p['t_up']

    def tile(v):
        return jnp.tile(v, (B_TILE,))

    kp['pvec'] = jnp.concatenate([
        tile(p['b_dw']), tile(p['s_dw']), tile(p['t_dw']),
        tile(p['b1']), tile(b2f), tile(p['s2']), tile(p['t2']),
        tile(b_upf)]).reshape(PVEC_LEN, 1)
    return kp


# ---------------------------------------------------------------------------
# deterministic parameter initialization (synthetic, no checkpoint)
# ---------------------------------------------------------------------------
def _bn_params(key, c):
    k1, k2, k3, k4 = jax.random.split(key, 4)
    gamma = jax.random.uniform(k1, (c,), jnp.float32, 0.5, 1.5)
    beta = 0.1 * jax.random.normal(k2, (c,), jnp.float32)
    mean = 0.1 * jax.random.normal(k3, (c,), jnp.float32)
    var = jax.random.uniform(k4, (c,), jnp.float32, 0.5, 1.5)
    scale = gamma / jnp.sqrt(var + EPS)
    shift = beta - mean * scale
    return scale, shift


def init_params(key):
    ks = jax.random.split(key, 12)
    p = {}
    p['w_dw'] = 0.3 * jax.random.normal(ks[0], (K, K, C_IN), jnp.float32)
    p['b_dw'] = 0.1 * jax.random.normal(ks[1], (C_IN,), jnp.float32)
    p['s_dw'], p['t_dw'] = _bn_params(ks[2], C_IN)
    p['w1'] = 0.3 * jax.random.normal(ks[3], (C_IN, C_HID), jnp.float32)
    p['b1'] = 0.1 * jax.random.normal(ks[4], (C_HID,), jnp.float32)
    p['s1'], p['t1'] = _bn_params(ks[5], C_HID)
    p['w2'] = 0.3 * jax.random.normal(ks[6], (C_HID, C_IN), jnp.float32)
    p['b2'] = 0.1 * jax.random.normal(ks[7], (C_IN,), jnp.float32)
    p['s2'], p['t2'] = _bn_params(ks[8], C_IN)
    p['w_up'] = 0.3 * jax.random.normal(ks[9], (UP_K, UP_K, C_IN, C_OUT), jnp.float32)
    p['b_up'] = 0.1 * jax.random.normal(ks[10], (C_OUT,), jnp.float32)
    p['s_up'], p['t_up'] = _bn_params(ks[11], C_OUT)
    return p


# ---------------------------------------------------------------------------
# pure-JAX reference (lax convolutions, tanh GELU) for verification
# ---------------------------------------------------------------------------
def reference(x_nchw, p):
    x = jnp.transpose(x_nchw, (0, 2, 3, 1))
    dw = lax.conv_general_dilated(
        x, p['w_dw'].reshape(K, K, 1, C_IN), window_strides=(1, 1),
        padding=((1, 1), (1, 1)), dimension_numbers=('NHWC', 'HWIO', 'NHWC'),
        feature_group_count=C_IN) + p['b_dw']
    r = jax.nn.gelu(dw, approximate=True) * p['s_dw'] + p['t_dw'] + x
    h = jnp.einsum('bhwc,cd->bhwd', r, p['w1']) + p['b1']
    h = jax.nn.gelu(h, approximate=True) * p['s1'] + p['t1']
    m = jnp.einsum('bhwc,cd->bhwd', h, p['w2']) + p['b2']
    m = jax.nn.gelu(m, approximate=True) * p['s2'] + p['t2']
    u = lax.conv_general_dilated(
        m, p['w_up'], window_strides=(UP_S, UP_S), padding=((1, 1), (1, 1)),
        dimension_numbers=('NHWC', 'HWIO', 'NHWC')) + p['b_up']
    u = jnp.maximum(u * p['s_up'] + p['t_up'], 0.0)
    return jnp.transpose(u, (0, 3, 1, 2))


if __name__ == "__main__":
    key = jax.random.PRNGKey(0)
    kx, kparam = jax.random.split(key)
    x = jax.random.normal(kx, (B, C_IN, H, W), jnp.float32)
    params = init_params(kparam)
    kparams = prepare_kernel_params(params)

    out = jax.jit(cmunext_block)(x, kparams)
    out = jax.block_until_ready(out)
    assert out.shape == (B, C_OUT, H_OUT, W_OUT), out.shape

    ref = reference(x, params)
    err = float(jnp.max(jnp.abs(out - ref)))
    if err < 1e-3:
        print("KERNEL_OK")
    else:
        print("MISMATCH max_abs_err =", err)
</pallas_src>

<mosaic_0001>
module attributes {stable_mosaic.version = 11 : i64} {
  func.func @cmunext_fused_kernel(%arg0: i32, %arg1: memref<1x8x256xf32, #tpu.memory_space<vmem>>, %arg2: memref<8x9xf32, #tpu.memory_space<vmem>>, %arg3: memref<9x256xf32, #tpu.memory_space<vmem>>, %arg4: memref<32x8xf32, #tpu.memory_space<vmem>>, %arg5: memref<8x32xf32, #tpu.memory_space<vmem>>, %arg6: memref<16x72xf32, #tpu.memory_space<vmem>>, %arg7: memref<256x64xf32, #tpu.memory_space<vmem>>, %arg8: memref<96x1xf32, #tpu.memory_space<vmem>>, %arg9: memref<1x16x64xf32, #tpu.memory_space<vmem>>, %arg10: memref<72x256xf32, #tpu.memory_space<vmem>>) attributes {dimension_semantics = [#tpu.dimension_semantics<parallel>], iteration_bounds = array<i64: 1>, scalar_prefetch = 0 : i64, scratch_operands = 1 : i64, tpu.core_type = #tpu.core_type<tc>, window_params = [{transform_indices = @transform_0, window_bounds = array<i64: 1, 8, 256>}, {pipeline_mode = #tpu.pipeline_mode<synchronous>, transform_indices = @transform_1, window_bounds = array<i64: 8, 9>}, {pipeline_mode = #tpu.pipeline_mode<synchronous>, transform_indices = @transform_2, window_bounds = array<i64: 9, 256>}, {pipeline_mode = #tpu.pipeline_mode<synchronous>, transform_indices = @transform_3, window_bounds = array<i64: 32, 8>}, {pipeline_mode = #tpu.pipeline_mode<synchronous>, transform_indices = @transform_4, window_bounds = array<i64: 8, 32>}, {pipeline_mode = #tpu.pipeline_mode<synchronous>, transform_indices = @transform_5, window_bounds = array<i64: 16, 72>}, {pipeline_mode = #tpu.pipeline_mode<synchronous>, transform_indices = @transform_6, window_bounds = array<i64: 256, 64>}, {pipeline_mode = #tpu.pipeline_mode<synchronous>, transform_indices = @transform_7, window_bounds = array<i64: 96, 1>}, {transform_indices = @transform_8, window_bounds = array<i64: 1, 16, 64>}]} {
    %c0 = arith.constant 0 : index
    %c0_0 = arith.constant 0 : index
    %c0_1 = arith.constant 0 : index
    %0 = vector.load %arg1[%c0, %c0_0, %c0_1] : memref<1x8x256xf32, #tpu.memory_space<vmem>>, vector<1x8x256xf32>
    %1 = vector.shape_cast %0 : vector<1x8x256xf32> to vector<8x256xf32>
    %c0_2 = arith.constant 0 : index
    %c0_3 = arith.constant 0 : index
    %2 = vector.load %arg2[%c0_2, %c0_3] : memref<8x9xf32, #tpu.memory_space<vmem>>, vector<8x9xf32>
    %c0_4 = arith.constant 0 : index
    %c0_5 = arith.constant 0 : index
    %3 = vector.load %arg3[%c0_4, %c0_5] : memref<9x256xf32, #tpu.memory_space<vmem>>, vector<9x256xf32>
    %c0_6 = arith.constant 0 : index
    %c0_7 = arith.constant 0 : index
    %4 = vector.load %arg8[%c0_6, %c0_7] : memref<96x1xf32, #tpu.memory_space<vmem>>, vector<96x1xf32>
    %5 = vector.extract_strided_slice %4 {offsets = [0, 0], sizes = [8, 1], strides = [1, 1]} : vector<96x1xf32> to vector<8x1xf32>
    %6 = vector.extract_strided_slice %4 {offsets = [8, 0], sizes = [8, 1], strides = [1, 1]} : vector<96x1xf32> to vector<8x1xf32>
    %7 = vector.extract_strided_slice %4 {offsets = [16, 0], sizes = [8, 1], strides = [1, 1]} : vector<96x1xf32> to vector<8x1xf32>
    %8 = vector.extract_strided_slice %4 {offsets = [24, 0], sizes = [32, 1], strides = [1, 1]} : vector<96x1xf32> to vector<32x1xf32>
    %9 = vector.extract_strided_slice %4 {offsets = [56, 0], sizes = [8, 1], strides = [1, 1]} : vector<96x1xf32> to vector<8x1xf32>
    %10 = vector.extract_strided_slice %4 {offsets = [64, 0], sizes = [8, 1], strides = [1, 1]} : vector<96x1xf32> to vector<8x1xf32>
    %11 = vector.extract_strided_slice %4 {offsets = [72, 0], sizes = [8, 1], strides = [1, 1]} : vector<96x1xf32> to vector<8x1xf32>
    %12 = vector.extract_strided_slice %4 {offsets = [80, 0], sizes = [16, 1], strides = [1, 1]} : vector<96x1xf32> to vector<16x1xf32>
    %13 = vector.extract_strided_slice %2 {offsets = [0, 4], sizes = [8, 1], strides = [1, 1]} : vector<8x9xf32> to vector<8x1xf32>
    %14 = vector.broadcast %13 : vector<8x1xf32> to vector<8x256xf32>
    %15 = arith.mulf %1, %14 : vector<8x256xf32>
    %c17_i32 = arith.constant 17 : i32
    %16 = tpu.dynamic_rotate %1 by %c17_i32 dim 1 : vector<8x256xf32>, i32 -> vector<8x256xf32>
    %17 = vector.extract_strided_slice %2 {offsets = [0, 0], sizes = [8, 1], strides = [1, 1]} : vector<8x9xf32> to vector<8x1xf32>
    %18 = vector.extract_strided_slice %3 {offsets = [0, 0], sizes = [1, 256], strides = [1, 1]} : vector<9x256xf32> to vector<1x256xf32>
    %19 = vector.broadcast %17 : vector<8x1xf32> to vector<8x256xf32>
    %20 = vector.broadcast %18 : vector<1x256xf32> to vector<8x256xf32>
    %21 = arith.mulf %19, %20 : vector<8x256xf32>
    %22 = arith.mulf %16, %21 : vector<8x256xf32>
    %23 = arith.addf %15, %22 : vector<8x256xf32>
    %c16_i32 = arith.constant 16 : i32
    %24 = tpu.dynamic_rotate %1 by %c16_i32 dim 1 : vector<8x256xf32>, i32 -> vector<8x256xf32>
    %25 = vector.extract_strided_slice %2 {offsets = [0, 1], sizes = [8, 1], strides = [1, 1]} : vector<8x9xf32> to vector<8x1xf32>
    %26 = vector.extract_strided_slice %3 {offsets = [1, 0], sizes = [1, 256], strides = [1, 1]} : vector<9x256xf32> to vector<1x256xf32>
    %27 = vector.broadcast %25 : vector<8x1xf32> to vector<8x256xf32>
    %28 = vector.broadcast %26 : vector<1x256xf32> to vector<8x256xf32>
    %29 = arith.mulf %27, %28 : vector<8x256xf32>
    %30 = arith.mulf %24, %29 : vector<8x256xf32>
    %31 = arith.addf %23, %30 : vector<8x256xf32>
    %c15_i32 = arith.constant 15 : i32
    %32 = tpu.dynamic_rotate %1 by %c15_i32 dim 1 : vector<8x256xf32>, i32 -> vector<8x256xf32>
    %33 = vector.extract_strided_slice %2 {offsets = [0, 2], sizes = [8, 1], strides = [1, 1]} : vector<8x9xf32> to vector<8x1xf32>
    %34 = vector.extract_strided_slice %3 {offsets = [2, 0], sizes = [1, 256], strides = [1, 1]} : vector<9x256xf32> to vector<1x256xf32>
    %35 = vector.broadcast %33 : vector<8x1xf32> to vector<8x256xf32>
    %36 = vector.broadcast %34 : vector<1x256xf32> to vector<8x256xf32>
    %37 = arith.mulf %35, %36 : vector<8x256xf32>
    %38 = arith.mulf %32, %37 : vector<8x256xf32>
    %39 = arith.addf %31, %38 : vector<8x256xf32>
    %c1_i32 = arith.constant 1 : i32
    %40 = tpu.dynamic_rotate %1 by %c1_i32 dim 1 : vector<8x256xf32>, i32 -> vector<8x256xf32>
    %41 = vector.extract_strided_slice %2 {offsets = [0, 3], sizes = [8, 1], strides = [1, 1]} : vector<8x9xf32> to vector<8x1xf32>
    %42 = vector.extract_strided_slice %3 {offsets = [3, 0], sizes = [1, 256], strides = [1, 1]} : vector<9x256xf32> to vector<1x256xf32>
    %43 = vector.broadcast %41 : vector<8x1xf32> to vector<8x256xf32>
    %44 = vector.broadcast %42 : vector<1x256xf32> to vector<8x256xf32>
    %45 = arith.mulf %43, %44 : vector<8x256xf32>
    %46 = arith.mulf %40, %45 : vector<8x256xf32>
    %47 = arith.addf %39, %46 : vector<8x256xf32>
    %c255_i32 = arith.constant 255 : i32
    %48 = tpu.dynamic_rotate %1 by %c255_i32 dim 1 : vector<8x256xf32>, i32 -> vector<8x256xf32>
    %49 = vector.extract_strided_slice %2 {offsets = [0, 5], sizes = [8, 1], strides = [1, 1]} : vector<8x9xf32> to vector<8x1xf32>
    %50 = vector.extract_strided_slice %3 {offsets = [5, 0], sizes = [1, 256], strides = [1, 1]} : vector<9x256xf32> to vector<1x256xf32>
    %51 = vector.broadcast %49 : vector<8x1xf32> to vector<8x256xf32>
    %52 = vector.broadcast %50 : vector<1x256xf32> to vector<8x256xf32>
    %53 = arith.mulf %51, %52 : vector<8x256xf32>
    %54 = arith.mulf %48, %53 : vector<8x256xf32>
    %55 = arith.addf %47, %54 : vector<8x256xf32>
    %c241_i32 = arith.constant 241 : i32
    %56 = tpu.dynamic_rotate %1 by %c241_i32 dim 1 : vector<8x256xf32>, i32 -> vector<8x256xf32>
    %57 = vector.extract_strided_slice %2 {offsets = [0, 6], sizes = [8, 1], strides = [1, 1]} : vector<8x9xf32> to vector<8x1xf32>
    %58 = vector.extract_strided_slice %3 {offsets = [6, 0], sizes = [1, 256], strides = [1, 1]} : vector<9x256xf32> to vector<1x256xf32>
    %59 = vector.broadcast %57 : vector<8x1xf32> to vector<8x256xf32>
    %60 = vector.broadcast %58 : vector<1x256xf32> to vector<8x256xf32>
    %61 = arith.mulf %59, %60 : vector<8x256xf32>
    %62 = arith.mulf %56, %61 : vector<8x256xf32>
    %63 = arith.addf %55, %62 : vector<8x256xf32>
    %c240_i32 = arith.constant 240 : i32
    %64 = tpu.dynamic_rotate %1 by %c240_i32 dim 1 : vector<8x256xf32>, i32 -> vector<8x256xf32>
    %65 = vector.extract_strided_slice %2 {offsets = [0, 7], sizes = [8, 1], strides = [1, 1]} : vector<8x9xf32> to vector<8x1xf32>
    %66 = vector.extract_strided_slice %3 {offsets = [7, 0], sizes = [1, 256], strides = [1, 1]} : vector<9x256xf32> to vector<1x256xf32>
    %67 = vector.broadcast %65 : vector<8x1xf32> to vector<8x256xf32>
    %68 = vector.broadcast %66 : vector<1x256xf32> to vector<8x256xf32>
    %69 = arith.mulf %67, %68 : vector<8x256xf32>
    %70 = arith.mulf %64, %69 : vector<8x256xf32>
    %71 = arith.addf %63, %70 : vector<8x256xf32>
    %c239_i32 = arith.constant 239 : i32
    %72 = tpu.dynamic_rotate %1 by %c239_i32 dim 1 : vector<8x256xf32>, i32 -> vector<8x256xf32>
    %73 = vector.extract_strided_slice %2 {offsets = [0, 8], sizes = [8, 1], strides = [1, 1]} : vector<8x9xf32> to vector<8x1xf32>
    %74 = vector.extract_strided_slice %3 {offsets = [8, 0], sizes = [1, 256], strides = [1, 1]} : vector<9x256xf32> to vector<1x256xf32>
    %75 = vector.broadcast %73 : vector<8x1xf32> to vector<8x256xf32>
    %76 = vector.broadcast %74 : vector<1x256xf32> to vector<8x256xf32>
    %77 = arith.mulf %75, %76 : vector<8x256xf32>
    %78 = arith.mulf %72, %77 : vector<8x256xf32>
    %79 = arith.addf %71, %78 : vector<8x256xf32>
    %80 = vector.broadcast %5 : vector<8x1xf32> to vector<8x256xf32>
    %81 = arith.addf %79, %80 : vector<8x256xf32>
    %cst = arith.constant 5.000000e-01 : f32
    %82 = vector.broadcast %cst : f32 to vector<8x256xf32>
    %83 = arith.mulf %82, %81 : vector<8x256xf32>
    %cst_8 = arith.constant 4.471500e-02 : f32
    %84 = vector.broadcast %cst_8 : f32 to vector<8x256xf32>
    %85 = arith.mulf %84, %81 : vector<8x256xf32>
    %86 = arith.mulf %85, %81 : vector<8x256xf32>
    %87 = arith.mulf %86, %81 : vector<8x256xf32>
    %88 = arith.addf %81, %87 : vector<8x256xf32>
    %cst_9 = arith.constant 0.797884583 : f32
    %89 = vector.broadcast %cst_9 : f32 to vector<8x256xf32>
    %90 = arith.mulf %89, %88 : vector<8x256xf32>
    %91 = math.tanh %90 : vector<8x256xf32>
    %cst_10 = arith.constant 1.000000e+00 : f32
    %92 = vector.broadcast %cst_10 : f32 to vector<8x256xf32>
    %93 = arith.addf %92, %91 : vector<8x256xf32>
    %94 = arith.mulf %83, %93 : vector<8x256xf32>
    %95 = vector.broadcast %6 : vector<8x1xf32> to vector<8x256xf32>
    %96 = arith.mulf %94, %95 : vector<8x256xf32>
    %97 = vector.broadcast %7 : vector<8x1xf32> to vector<8x256xf32>
    %98 = arith.addf %96, %97 : vector<8x256xf32>
    %99 = arith.addf %98, %1 : vector<8x256xf32>
    %c0_11 = arith.constant 0 : index
    %c0_12 = arith.constant 0 : index
    %100 = vector.load %arg4[%c0_11, %c0_12] : memref<32x8xf32, #tpu.memory_space<vmem>>, vector<32x8xf32>
    %cst_13 = arith.constant dense<0.000000e+00> : vector<32x256xf32>
    %101 = tpu.matmul %100, %99, %cst_13 {dimension_numbers = #tpu.dot_dimension_numbers<[1], [0], [0], [1], [0, 0, 1, 1], [], []>} : vector<32x8xf32>, vector<8x256xf32>, vector<32x256xf32> -> vector<32x256xf32>
    %102 = vector.broadcast %8 : vector<32x1xf32> to vector<32x256xf32>
    %103 = arith.addf %101, %102 : vector<32x256xf32>
    %cst_14 = arith.constant 5.000000e-01 : f32
    %104 = vector.broadcast %cst_14 : f32 to vector<32x256xf32>
    %105 = arith.mulf %104, %103 : vector<32x256xf32>
    %cst_15 = arith.constant 4.471500e-02 : f32
    %106 = vector.broadcast %cst_15 : f32 to vector<32x256xf32>
    %107 = arith.mulf %106, %103 : vector<32x256xf32>
    %108 = arith.mulf %107, %103 : vector<32x256xf32>
    %109 = arith.mulf %108, %103 : vector<32x256xf32>
    %110 = arith.addf %103, %109 : vector<32x256xf32>
    %cst_16 = arith.constant 0.797884583 : f32
    %111 = vector.broadcast %cst_16 : f32 to vector<32x256xf32>
    %112 = arith.mulf %111, %110 : vector<32x256xf32>
    %113 = math.tanh %112 : vector<32x256xf32>
    %cst_17 = arith.constant 1.000000e+00 : f32
    %114 = vector.broadcast %cst_17 : f32 to vector<32x256xf32>
    %115 = arith.addf %114, %113 : vector<32x256xf32>
    %116 = arith.mulf %105, %115 : vector<32x256xf32>
    %c0_18 = arith.constant 0 : index
    %c0_19 = arith.constant 0 : index
    %117 = vector.load %arg5[%c0_18, %c0_19] : memref<8x32xf32, #tpu.memory_space<vmem>>, vector<8x32xf32>
    %cst_20 = arith.constant dense<0.000000e+00> : vector<8x256xf32>
    %118 = tpu.matmul %117, %116, %cst_20 {dimension_numbers = #tpu.dot_dimension_numbers<[1], [0], [0], [1], [0, 0, 1, 1], [], []>} : vector<8x32xf32>, vector<32x256xf32>, vector<8x256xf32> -> vector<8x256xf32>
    %119 = vector.broadcast %9 : vector<8x1xf32> to vector<8x256xf32>
    %120 = arith.addf %118, %119 : vector<8x256xf32>
    %cst_21 = arith.constant 5.000000e-01 : f32
    %121 = vector.broadcast %cst_21 : f32 to vector<8x256xf32>
    %122 = arith.mulf %121, %120 : vector<8x256xf32>
    %cst_22 = arith.constant 4.471500e-02 : f32
    %123 = vector.broadcast %cst_22 : f32 to vector<8x256xf32>
    %124 = arith.mulf %123, %120 : vector<8x256xf32>
    %125 = arith.mulf %124, %120 : vector<8x256xf32>
    %126 = arith.mulf %125, %120 : vector<8x256xf32>
    %127 = arith.addf %120, %126 : vector<8x256xf32>
    %cst_23 = arith.constant 0.797884583 : f32
    %128 = vector.broadcast %cst_23 : f32 to vector<8x256xf32>
    %129 = arith.mulf %128, %127 : vector<8x256xf32>
    %130 = math.tanh %129 : vector<8x256xf32>
    %cst_24 = arith.constant 1.000000e+00 : f32
    %131 = vector.broadcast %cst_24 : f32 to vector<8x256xf32>
    %132 = arith.addf %131, %130 : vector<8x256xf32>
    %133 = arith.mulf %122, %132 : vector<8x256xf32>
    %134 = vector.broadcast %10 : vector<8x1xf32> to vector<8x256xf32>
    %135 = arith.mulf %133, %134 : vector<8x256xf32>
    %136 = vector.broadcast %11 : vector<8x1xf32> to vector<8x256xf32>
    %137 = arith.addf %135, %136 : vector<8x256xf32>
    %c17_i32_25 = arith.constant 17 : i32
    %138 = tpu.dynamic_rotate %137 by %c17_i32_25 dim 1 : vector<8x256xf32>, i32 -> vector<8x256xf32>
    %139 = vector.extract_strided_slice %3 {offsets = [0, 0], sizes = [1, 256], strides = [1, 1]} : vector<9x256xf32> to vector<1x256xf32>
    %140 = vector.broadcast %139 : vector<1x256xf32> to vector<8x256xf32>
    %141 = arith.mulf %138, %140 : vector<8x256xf32>
    %c0_26 = arith.constant 0 : index
    %c0_27 = arith.constant 0 : index
    %142 = vector.load %arg10[%c0_26, %c0_27] : memref<72x256xf32, #tpu.memory_space<vmem>>, vector<8x256xf32>
    tpu.vector_store %arg10[%c0_26, %c0_27], %141 {strides = array<i32>} : memref<72x256xf32, #tpu.memory_space<vmem>>, vector<8x256xf32>,
    %c16_i32_28 = arith.constant 16 : i32
    %143 = tpu.dynamic_rotate %137 by %c16_i32_28 dim 1 : vector<8x256xf32>, i32 -> vector<8x256xf32>
    %144 = vector.extract_strided_slice %3 {offsets = [1, 0], sizes = [1, 256], strides = [1, 1]} : vector<9x256xf32> to vector<1x256xf32>
    %145 = vector.broadcast %144 : vector<1x256xf32> to vector<8x256xf32>
    %146 = arith.mulf %143, %145 : vector<8x256xf32>
    %c8 = arith.constant 8 : index
    %c0_29 = arith.constant 0 : index
    %147 = vector.load %arg10[%c8, %c0_29] : memref<72x256xf32, #tpu.memory_space<vmem>>, vector<8x256xf32>
    tpu.vector_store %arg10[%c8, %c0_29], %146 {strides = array<i32>} : memref<72x256xf32, #tpu.memory_space<vmem>>, vector<8x256xf32>,
    %c15_i32_30 = arith.constant 15 : i32
    %148 = tpu.dynamic_rotate %137 by %c15_i32_30 dim 1 : vector<8x256xf32>, i32 -> vector<8x256xf32>
    %149 = vector.extract_strided_slice %3 {offsets = [2, 0], sizes = [1, 256], strides = [1, 1]} : vector<9x256xf32> to vector<1x256xf32>
    %150 = vector.broadcast %149 : vector<1x256xf32> to vector<8x256xf32>
    %151 = arith.mulf %148, %150 : vector<8x256xf32>
    %c16 = arith.constant 16 : index
    %c0_31 = arith.constant 0 : index
    %152 = vector.load %arg10[%c16, %c0_31] : memref<72x256xf32, #tpu.memory_space<vmem>>, vector<8x256xf32>
    tpu.vector_store %arg10[%c16, %c0_31], %151 {strides = array<i32>} : memref<72x256xf32, #tpu.memory_space<vmem>>, vector<8x256xf32>,
    %c1_i32_32 = arith.constant 1 : i32
    %153 = tpu.dynamic_rotate %137 by %c1_i32_32 dim 1 : vector<8x256xf32>, i32 -> vector<8x256xf32>
    %154 = vector.extract_strided_slice %3 {offsets = [3, 0], sizes = [1, 256], strides = [1, 1]} : vector<9x256xf32> to vector<1x256xf32>
    %155 = vector.broadcast %154 : vector<1x256xf32> to vector<8x256xf32>
    %156 = arith.mulf %153, %155 : vector<8x256xf32>
    %c24 = arith.constant 24 : index
    %c0_33 = arith.constant 0 : index
    %157 = vector.load %arg10[%c24, %c0_33] : memref<72x256xf32, #tpu.memory_space<vmem>>, vector<8x256xf32>
    tpu.vector_store %arg10[%c24, %c0_33], %156 {strides = array<i32>} : memref<72x256xf32, #tpu.memory_space<vmem>>, vector<8x256xf32>,
    %c32 = arith.constant 32 : index
    %c0_34 = arith.constant 0 : index
    %158 = vector.load %arg10[%c32, %c0_34] : memref<72x256xf32, #tpu.memory_space<vmem>>, vector<8x256xf32>
    tpu.vector_store %arg10[%c32, %c0_34], %137 {strides = array<i32>} : memref<72x256xf32, #tpu.memory_space<vmem>>, vector<8x256xf32>,
    %c255_i32_35 = arith.constant 255 : i32
    %159 = tpu.dynamic_rotate %137 by %c255_i32_35 dim 1 : vector<8x256xf32>, i32 -> vector<8x256xf32>
    %160 = vector.extract_strided_slice %3 {offsets = [5, 0], sizes = [1, 256], strides = [1, 1]} : vector<9x256xf32> to vector<1x256xf32>
    %161 = vector.broadcast %160 : vector<1x256xf32> to vector<8x256xf32>
    %162 = arith.mulf %159, %161 : vector<8x256xf32>
    %c40 = arith.constant 40 : index
    %c0_36 = arith.constant 0 : index
    %163 = vector.load %arg10[%c40, %c0_36] : memref<72x256xf32, #tpu.memory_space<vmem>>, vector<8x256xf32>
    tpu.vector_store %arg10[%c40, %c0_36], %162 {strides = array<i32>} : memref<72x256xf32, #tpu.memory_space<vmem>>, vector<8x256xf32>,
    %c241_i32_37 = arith.constant 241 : i32
    %164 = tpu.dynamic_rotate %137 by %c241_i32_37 dim 1 : vector<8x256xf32>, i32 -> vector<8x256xf32>
    %165 = vector.extract_strided_slice %3 {offsets = [6, 0], sizes = [1, 256], strides = [1, 1]} : vector<9x256xf32> to vector<1x256xf32>
    %166 = vector.broadcast %165 : vector<1x256xf32> to vector<8x256xf32>
    %167 = arith.mulf %164, %166 : vector<8x256xf32>
    %c48 = arith.constant 48 : index
    %c0_38 = arith.constant 0 : index
    %168 = vector.load %arg10[%c48, %c0_38] : memref<72x256xf32, #tpu.memory_space<vmem>>, vector<8x256xf32>
    tpu.vector_store %arg10[%c48, %c0_38], %167 {strides = array<i32>} : memref<72x256xf32, #tpu.memory_space<vmem>>, vector<8x256xf32>,
    %c240_i32_39 = arith.constant 240 : i32
    %169 = tpu.dynamic_rotate %137 by %c240_i32_39 dim 1 : vector<8x256xf32>, i32 -> vector<8x256xf32>
    %170 = vector.extract_strided_slice %3 {offsets = [7, 0], sizes = [1, 256], strides = [1, 1]} : vector<9x256xf32> to vector<1x256xf32>
    %171 = vector.broadcast %170 : vector<1x256xf32> to vector<8x256xf32>
    %172 = arith.mulf %169, %171 : vector<8x256xf32>
    %c56 = arith.constant 56 : index
    %c0_40 = arith.constant 0 : index
    %173 = vector.load %arg10[%c56, %c0_40] : memref<72x256xf32, #tpu.memory_space<vmem>>, vector<8x256xf32>
    tpu.vector_store %arg10[%c56, %c0_40], %172 {strides = array<i32>} : memref<72x256xf32, #tpu.memory_space<vmem>>, vector<8x256xf32>,
    %c239_i32_41 = arith.constant 239 : i32
    %174 = tpu.dynamic_rotate %137 by %c239_i32_41 dim 1 : vector<8x256xf32>, i32 -> vector<8x256xf32>
    %175 = vector.extract_strided_slice %3 {offsets = [8, 0], sizes = [1, 256], strides = [1, 1]} : vector<9x256xf32> to vector<1x256xf32>
    %176 = vector.broadcast %175 : vector<1x256xf32> to vector<8x256xf32>
    %177 = arith.mulf %174, %176 : vector<8x256xf32>
    %c64 = arith.constant 64 : index
    %c0_42 = arith.constant 0 : index
    %178 = vector.load %arg10[%c64, %c0_42] : memref<72x256xf32, #tpu.memory_space<vmem>>, vector<8x256xf32>
    tpu.vector_store %arg10[%c64, %c0_42], %177 {strides = array<i32>} : memref<72x256xf32, #tpu.memory_space<vmem>>, vector<8x256xf32>,
    %c0_43 = arith.constant 0 : index
    %c0_44 = arith.constant 0 : index
    %179 = vector.load %arg6[%c0_43, %c0_44] : memref<16x72xf32, #tpu.memory_space<vmem>>, vector<16x72xf32>
    %c0_45 = arith.constant 0 : index
    %c0_46 = arith.constant 0 : index
    %180 = vector.load %arg10[%c0_45, %c0_46] : memref<72x256xf32, #tpu.memory_space<vmem>>, vector<72x256xf32>
    %cst_47 = arith.constant dense<0.000000e+00> : vector<16x256xf32>
    %181 = tpu.matmul %179, %180, %cst_47 {dimension_numbers = #tpu.dot_dimension_numbers<[1], [0], [0], [1], [0, 0, 1, 1], [], []>} : vector<16x72xf32>, vector<72x256xf32>, vector<16x256xf32> -> vector<16x256xf32>
    %c0_48 = arith.constant 0 : index
    %c0_49 = arith.constant 0 : index
    %182 = vector.load %arg7[%c0_48, %c0_49] : memref<256x64xf32, #tpu.memory_space<vmem>>, vector<256x64xf32>
    %cst_50 = arith.constant dense<0.000000e+00> : vector<16x64xf32>
    %183 = tpu.matmul %181, %182, %cst_50 {dimension_numbers = #tpu.dot_dimension_numbers<[1], [0], [0], [1], [0, 0, 1, 1], [], []>} : vector<16x256xf32>, vector<256x64xf32>, vector<16x64xf32> -> vector<16x64xf32>
    %184 = vector.broadcast %12 : vector<16x1xf32> to vector<16x64xf32>
    %185 = arith.addf %183, %184 : vector<16x64xf32>
    %cst_51 = arith.constant 0.000000e+00 : f32
    %186 = vector.broadcast %cst_51 : f32 to vector<16x64xf32>
    %187 = arith.maximumf %185, %186 : vector<16x64xf32>
    %c0_52 = arith.constant 0 : index
    %c0_53 = arith.constant 0 : index
    %c0_54 = arith.constant 0 : index
    %188 = vector.load %arg9[%c0_52, %c0_53, %c0_54] : memref<1x16x64xf32, #tpu.memory_space<vmem>>, vector<1x16x64xf32>
    %189 = vector.shape_cast %188 : vector<1x16x64xf32> to vector<16x64xf32>
    %190 = vector.shape_cast %187 : vector<16x64xf32> to vector<1x16x64xf32>
    tpu.vector_store %arg9[%c0_52, %c0_53, %c0_54], %190 {strides = array<i32>} : memref<1x16x64xf32, #tpu.memory_space<vmem>>, vector<1x16x64xf32>,
    return
  }
  func.func @transform_0(%arg0: i32) -> (i32, i32, i32) {
    %c0_i32 = arith.constant 0 : i32
    %c0_i32_0 = arith.constant 0 : i32
    %c0_i32_1 = arith.constant 0 : i32
    return %arg0, %c0_i32, %c0_i32_0 : i32, i32, i32
  }
  func.func @transform_1(%arg0: i32) -> (i32, i32) {
    %c0_i32 = arith.constant 0 : i32
    %c0_i32_0 = arith.constant 0 : i32
    %c0_i32_1 = arith.constant 0 : i32
    return %c0_i32, %c0_i32_0 : i32, i32
  }
  func.func @transform_2(%arg0: i32) -> (i32, i32) {
    %c0_i32 = arith.constant 0 : i32
    %c0_i32_0 = arith.constant 0 : i32
    %c0_i32_1 = arith.constant 0 : i32
    return %c0_i32, %c0_i32_0 : i32, i32
  }
  func.func @transform_3(%arg0: i32) -> (i32, i32) {
    %c0_i32 = arith.constant 0 : i32
    %c0_i32_0 = arith.constant 0 : i32
    %c0_i32_1 = arith.constant 0 : i32
    return %c0_i32, %c0_i32_0 : i32, i32
  }
  func.func @transform_4(%arg0: i32) -> (i32, i32) {
    %c0_i32 = arith.constant 0 : i32
    %c0_i32_0 = arith.constant 0 : i32
    %c0_i32_1 = arith.constant 0 : i32
    return %c0_i32, %c0_i32_0 : i32, i32
  }
  func.func @transform_5(%arg0: i32) -> (i32, i32) {
    %c0_i32 = arith.constant 0 : i32
    %c0_i32_0 = arith.constant 0 : i32
    %c0_i32_1 = arith.constant 0 : i32
    return %c0_i32, %c0_i32_0 : i32, i32
  }
  func.func @transform_6(%arg0: i32) -> (i32, i32) {
    %c0_i32 = arith.constant 0 : i32
    %c0_i32_0 = arith.constant 0 : i32
    %c0_i32_1 = arith.constant 0 : i32
    return %c0_i32, %c0_i32_0 : i32, i32
  }
  func.func @transform_7(%arg0: i32) -> (i32, i32) {
    %c0_i32 = arith.constant 0 : i32
    %c0_i32_0 = arith.constant 0 : i32
    %c0_i32_1 = arith.constant 0 : i32
    return %c0_i32, %c0_i32_0 : i32, i32
  }
  func.func @transform_8(%arg0: i32) -> (i32, i32, i32) {
    %c0_i32 = arith.constant 0 : i32
    %c0_i32_0 = arith.constant 0 : i32
    %c0_i32_1 = arith.constant 0 : i32
    return %arg0, %c0_i32, %c0_i32_0 : i32, i32, i32
  }
}

</mosaic_0001>

<bundles_post_ra>
// kernel: cmunext_block.1
= control target key start
LH: loop header
LB: loop body
LE: loop exit
PB: predicated region body
PF: predicated region fallthrough
CT: control target
= control target key end

     0   :  { %v819_v0 = vmov 0   ;;  %v820_v3 = vmov 4   ;;  %s821_s9 = smov 17   ;;  %v822_v4 = vmov 1   ;;  %v824_v6 = vmov 2   ;;  %s825_s12 = smov 15   ;;  %s1357_s1 = inlined_call_operand.vmem [shape: f32[8,9], index: 1, kind: input, shape index: {}]   ;;  %s1358_s0 = inlined_call_operand.vmem [shape: f32[1,8,256], index: 0, kind: input, shape index: {}]   ;;  %s1359_s2 = inlined_call_operand.vmem [shape: f32[9,256], index: 2, kind: input, shape index: {}]   ;;  %s1360_s7 = inlined_call_operand.vmem [shape: f32[96,1], index: 7, kind: input, shape index: {}]   ;;  %s1361_s3 = inlined_call_operand.vmem [shape: f32[32,8], index: 3, kind: input, shape index: {}]   ;;  %s1362_s4 = inlined_call_operand.vmem [shape: f32[8,32], index: 4, kind: input, shape index: {}]   ;;  %s1363_s6 = inlined_call_operand.vmem [shape: f32[256,64], index: 6, kind: input, shape index: {}]   ;;  %s1364_s5 = inlined_call_operand.vmem [shape: f32[16,72], index: 5, kind: input, shape index: {}]   ;;  %s1365_s8 = inlined_call_operand.vmem [shape: f32[1,16,64], index: 8, kind: output, shape index: {}]  }
   0x1   :  { %782 = vset.pattern.permute.xlu0 %v819_v0  ;;  %v31_v1 = vld [vmem:[%s1357_s1] sm:$0xff]  ;;  %v887_v2 = vld [vmem:[%s1358_s0 + $0x8] sm:$0xff]  ;;  %783 = vset.pattern.permute.xlu1 %v820_v3  ;;  %s823_s1 = smov 16   ;;  %v826_v7 = vmov 3   ;;  %v828_v8 = vmov 5   ;;  %s829_s13 = smov 127   ;;  %v59_v36 = vlaneseq }
   0x2   :  { %65 = vperm.xlu0 %782, %v31_v1   ;;  %57 = vrot.lane.b32.xlu1 %v887_v2, %s821_s9  ;;  %v894_v5 = vld [vmem:[%s1358_s0] sm:$0xff]  ;;  %s827_s0 = smov 1   ;;  %s830_s14 = smov 113   ;;  %v831_v9 = vmov 6   ;;  %v833_v10 = vmov 7   ;;  %v835_v11 = vmov 8  }
   0x3   :  { %784 = vset.pattern.permute.xlu2 %v822_v4  ;;  %s832_s15 = smov 112   ;;  %s834_s16 = smov 111   ;;  %v37_v12 = vld [vmem:[%s1360_s7 + $0x8] sm:$0xff]  ;;  %v36_v13 = vld [vmem:[%s1360_s7] sm:$0xff]  ;;  %v38_v14 = vld [vmem:[%s1360_s7 + $0x10] sm:$0xff]  ;;  %v960_v38 = vand.u32 127, %v59_v36 }
   0x4   :  { %84 = vperm.xlu2 %784, %v31_v1   ;;  %v41_v15 = vld [vmem:[%s1360_s7 + $0x28] sm:$0xff]  ;;  %v42_v16 = vld [vmem:[%s1360_s7 + $0x30] sm:$0xff]  ;;  %v40_v17 = vld [vmem:[%s1360_s7 + $0x20] sm:$0xff]  ;;  %vm274_vm8 = vcmask 64512   ;;  %vm423_vm9 = vcmask 261120   ;;  %vm601_vm10 = vcmask 588800  }
   0x5   :  { %v43_v18 = vld [vmem:[%s1360_s7 + $0x38] sm:$0xff]  ;;  %v44_v20 = vld [vmem:[%s1360_s7 + $0x40] sm:$0xff]  ;;  %v45_v21 = vld [vmem:[%s1360_s7 + $0x48] sm:$0xff]  ;;  %vm61_vm0 = vcmp.lt.s32.totalorder %v960_v38, 17  ;;  %vm80_vm1 = vcmp.lt.s32.totalorder %v960_v38, 16  ;;  %vm99_vm2 = vcmp.lt.s32.totalorder %v960_v38, 15 }
   0x6   :  { %v39_v19 = vld [vmem:[%s1360_s7 + $0x18] sm:$0xff]  ;;  %v965_v39 = vld [vmem:[%s1359_s2] sm:$0xff]  ;;  %v970_v41 = vld [vmem:[%s1359_s2 + $0x8] sm:$0xff]  ;;  %vm118_vm3 = vcmp.lt.s32.totalorder %v960_v38, 1  ;;  %vm137_vm4 = vcmp.lt.s32.totalorder %v960_v38, 127  ;;  %vm156_vm5 = vcmp.lt.s32.totalorder %v960_v38, 113 }
   0x7   :  { %v87_v42 = vperm.slane %v965_v39, 1  ;;  %v68_v44 = vperm.slane %v965_v39, 0  ;;  %v88_v45 = vperm.slane %v970_v41, 1  ;;  %v69_v46 = vperm.slane %v970_v41, 0 }
   0x8   :  { %v106_v53 = vperm.slane %v965_v39, 2  ;;  %v107_v55 = vperm.slane %v970_v41, 2  ;;  %v125_v56 = vperm.slane %v965_v39, 3  ;;  %v144_v3 = vperm.slane %v965_v39, 5 }
   0x9   :  { %v145_v4 = vperm.slane %v970_v41, 5  ;;  %vm175_vm6 = vcmp.lt.s32.totalorder %v960_v38, 112  ;;  %vm194_vm7 = vcmp.lt.s32.totalorder %v960_v38, 111  ;;  %vm744_vm11 = vcmask 523264  }
   0xa   :  { %50 = vperm.xlu1 %783, %v31_v1   ;;  %55 = vrot.lane.b32.xlu0 %v894_v5, %s821_s9 }
   0xc   :  { %76 = vrot.lane.b32.xlu2 %v894_v5, %s823_s1 }
   0xd   :  { %792 = vset.pattern.permute.xlu2 %v819_v0 }
  0x12   :  { %785 = vset.pattern.permute.xlu1 %v824_v6  ;;  %78 = vrot.lane.b32.xlu0 %v887_v2, %s823_s1 }
  0x13   :  { %103 = vperm.xlu1 %785, %v31_v1  }
  0x14   :  { %95 = vrot.lane.b32.xlu2 %v894_v5, %s825_s12 }
  0x1a   :  { %97 = vrot.lane.b32.xlu0 %v887_v2, %s825_s12 }
  0x1b   :  { %786 = vset.pattern.permute.xlu1 %v826_v7 }
  0x1c   :  { %122 = vperm.xlu1 %786, %v31_v1   ;;  %114 = vrot.lane.b32.xlu2 %v894_v5, %s827_s0 }
  0x22   :  { %116 = vrot.lane.b32.xlu0 %v887_v2, %s827_s0 }
  0x24   :  { %787 = vset.pattern.permute.xlu1 %v828_v8  ;;  %133 = vrot.lane.b32.xlu2 %v894_v5, %s829_s13 }
  0x25   :  { %141 = vperm.xlu1 %787, %v31_v1  }
  0x2a   :  { %135 = vrot.lane.b32.xlu0 %v887_v2, %s829_s13 }
  0x2c   :  { %152 = vrot.lane.b32.xlu2 %v894_v5, %s830_s14 }
  0x2d   :  { %788 = vset.pattern.permute.xlu1 %v831_v9 }
  0x2e   :  { %160 = vperm.xlu1 %788, %v31_v1  }
  0x32   :  { %154 = vrot.lane.b32.xlu0 %v887_v2, %s830_s14 }
  0x34   :  { %171 = vrot.lane.b32.xlu2 %v894_v5, %s832_s15 }
  0x36   :  { %789 = vset.pattern.permute.xlu1 %v833_v10 }
  0x37   :  { %179 = vperm.xlu1 %789, %v31_v1  }
  0x3a   :  { %173 = vrot.lane.b32.xlu0 %v887_v2, %s832_s15 }
  0x3c   :  { %190 = vrot.lane.b32.xlu2 %v894_v5, %s834_s16 }
  0x3f   :  { %790 = vset.pattern.permute.xlu1 %v835_v11 }
  0x40   :  { %198 = vperm.xlu1 %790, %v31_v1  }
  0x42   :  { %192 = vrot.lane.b32.xlu0 %v887_v2, %s834_s16 }
  0x44   :  { %236 = vperm.xlu2 %792, %v37_v12  }
  0x48   :  { %791 = vset.pattern.permute.xlu1 %v819_v0  ;;  %v126_v0 = vperm.slane %v970_v41, 3 }
  0x49   :  { %211 = vperm.xlu1 %791, %v36_v13   ;;  %v163_v13 = vperm.slane %v965_v39, 6 }
  0x4a   :  { %243 = vperm.xlu0 %782, %v38_v14   ;;  %v164_v14 = vperm.slane %v970_v41, 6 }
  0x4c   :  { %266 = vperm.xlu2 %792, %v41_v15  }
  0x51   :  { %271 = vperm.xlu1 %791, %v42_v16  }
  0x52   :  { %261 = vperm.xlu0 %782, %v40_v17  }
  0x54   :  { %420 = vperm.xlu2 %792, %v43_v18  }
  0x59   :  { %256 = vperm.xlu1 %791, %v39_v19  }
  0x5a   :  { %487 = vperm.xlu0 %782, %v44_v20  }
  0x5e   :  { %v85_v22 = vpop.permute.xlu2 %84 }
  0x5f   :  { %v89_v48 = vmul.f32 %v87_v42, %v85_v22  ;;  %v90_v51 = vmul.f32 %v88_v45, %v85_v22 }
  0x61   :  { %494 = vperm.xlu1 %791, %v45_v21  }
  0x66   :  { %v77_v25 = vpop.permute.xlu2 %76 }
  0x6e   :  { %v96_v28 = vpop.permute.xlu2 %95 }
  0x74   :  { %v66_v23 = vpop.permute.xlu0 %65  ;;  %v58_v24 = vpop.permute.xlu1 %57 }
  0x75   :  { %v70_v50 = vmul.f32 %v68_v44, %v66_v23  ;;  %v71_v54 = vmul.f32 %v69_v46, %v66_v23 }
  0x76   :  { %v115_v31 = vpop.permute.xlu2 %114 }
  0x7c   :  { %v51_v26 = vpop.permute.xlu1 %50  ;;  %v56_v27 = vpop.permute.xlu0 %55 }
  0x7d   :  { %v63_v49 = vsel %vm61_vm0, %v58_v24, %v56_v27  ;;  %v62_v52 = vsel %vm61_vm0, %v56_v27, %v58_v24  ;;  %v53_v58 = vmul.f32 %v51_v26, %v894_v5  ;;  %v54_v62 = vmul.f32 %v51_v26, %v887_v2 }
  0x7e   :  { %v956_v35 = vpop.permute.xlu2 %133  ;;  %v72_v59 = vmul.f32 %v70_v50, %v63_v49  ;;  %v73_v63 = vmul.f32 %v71_v54, %v62_v52  ;;  %v183_v26 = vperm.slane %v970_v41, 7  ;;  %v674_v41 = vld [vmem:[%s1363_s6 + $0xa0] sm:$0xff] }
  0x80   :  { %v74_v11 = vadd.f32 %v72_v59, %v53_v58  ;;  %v75_v16 = vadd.f32 %v73_v63, %v54_v62 }
  0x84   :  { %v79_v29 = vpop.permute.xlu0 %78 }
  0x85   :  { %v104_v30 = vpop.permute.xlu1 %103  ;;  %v81_v60 = vsel %vm80_vm1, %v77_v25, %v79_v29  ;;  %v82_v61 = vsel %vm80_vm1, %v79_v29, %v77_v25  ;;  %v182_v25 = vperm.slane %v965_v39, 7  ;;  %v657_v39 = vld [vmem:[%s1363_s6 + $0x18] sm:$0xff] }
  0x86   :  { %v973_v43 = vpop.permute.xlu2 %152  ;;  %v91_v6 = vmul.f32 %v89_v48, %v82_v61  ;;  %v92_v7 = vmul.f32 %v90_v51, %v81_v60  ;;  %v108_v8 = vmul.f32 %v106_v53, %v104_v30  ;;  %v109_v12 = vmul.f32 %v107_v55, %v104_v30 }
  0x88   :  { %v93_v23 = vadd.f32 %v91_v6, %v74_v11  ;;  %v94_v24 = vadd.f32 %v92_v7, %v75_v16 }
  0x8c   :  { %v98_v32 = vpop.permute.xlu0 %97 }
  0x8d   :  { %v101_v1 = vsel %vm99_vm2, %v98_v32, %v96_v28  ;;  %v100_v9 = vsel %vm99_vm2, %v96_v28, %v98_v32 }
  0x8e   :  { %v123_v33 = vpop.permute.xlu1 %122  ;;  %v172_v10 = vpop.permute.xlu2 %171  ;;  %v110_v17 = vmul.f32 %v108_v8, %v101_v1  ;;  %v111_v20 = vmul.f32 %v109_v12, %v100_v9 }
  0x8f   :  { %v127_v21 = vmul.f32 %v125_v56, %v123_v33  ;;  %v128_v22 = vmul.f32 %v126_v0, %v123_v33 }
  0x90   :  { %v112_v32 = vadd.f32 %v110_v17, %v93_v23  ;;  %v113_v36 = vadd.f32 %v111_v20, %v94_v24 }
  0x94   :  { %v117_v34 = vpop.permute.xlu0 %116 }
  0x95   :  { %v119_v18 = vsel %vm118_vm3, %v115_v31, %v117_v34  ;;  %v120_v19 = vsel %vm118_vm3, %v117_v34, %v115_v31 }
  0x96   :  { %v129_v28 = vmul.f32 %v127_v21, %v120_v19  ;;  %v130_v29 = vmul.f32 %v128_v22, %v119_v18  ;;  %v191_v1 = vpop.permute.xlu2 %190 }
  0x97   :  { %v958_v37 = vpop.permute.xlu1 %141 }
  0x98   :  { %v146_v33 = vmul.f32 %v144_v3, %v958_v37  ;;  %v147_v34 = vmul.f32 %v145_v4, %v958_v37  ;;  %v1057_v37 = vld [vmem:[%s1359_s2 + $0x18] ss:$0 sm:$0xff]  ;;  %v131_v52 = vadd.f32 %v129_v28, %v112_v32  ;;  %v132_v54 = vadd.f32 %v130_v29, %v113_v36 }
  0x9c   :  { %v136_v40 = vpop.permute.xlu0 %135 }
  0x9d   :  { %v138_v30 = vsel %vm137_vm4, %v956_v35, %v136_v40  ;;  %v139_v31 = vsel %vm137_vm4, %v136_v40, %v956_v35  ;;  %v1052_v40 = vld [vmem:[%s1359_s2 + $0x10] ss:$0 sm:$0xff] }
  0x9e   :  { %v148_v49 = vmul.f32 %v146_v33, %v138_v30  ;;  %v149_v50 = vmul.f32 %v147_v34, %v139_v31 }
  0xa0   :  { %v979_v47 = vpop.permute.xlu1 %160  ;;  %v150_v7 = vadd.f32 %v148_v49, %v131_v52  ;;  %v151_v8 = vadd.f32 %v149_v50, %v132_v54 }
  0xa1   :  { %v165_v51 = vmul.f32 %v163_v13, %v979_v47 }
  0xa4   :  { %v155_v57 = vpop.permute.xlu0 %154 }
  0xa5   :  { %v157_v48 = vsel %vm156_vm5, %v973_v43, %v155_v57  ;;  %v158_v35 = vsel %vm156_vm5, %v155_v57, %v973_v43  ;;  %v166_v43 = vmul.f32 %v164_v14, %v979_v47 }
  0xa6   :  { %v167_v59 = vmul.f32 %v165_v51, %v157_v48 }
  0xa7   :  { %v168_v60 = vmul.f32 %v166_v43, %v158_v35 }
  0xa8   :  { %v169_v17 = vadd.f32 %v167_v59, %v150_v7  ;;  %v237_v59 = vpop.permute.xlu2 %236  ;;  %v250_v7 = vld [vmem:[%s1361_s3] sm:$0xff] }
  0xa9   :  { %v180_v15 = vpop.permute.xlu1 %179  ;;  %v170_v18 = vadd.f32 %v168_v60, %v151_v8 }
  0xaa   :  { %v184_v61 = vmul.f32 %v182_v25, %v180_v15  ;;  %v185_v62 = vmul.f32 %v183_v26, %v180_v15 }
  0xac   :  { %v174_v27 = vpop.permute.xlu0 %173 }
  0xad   :  { %v176_v57 = vsel %vm175_vm6, %v172_v10, %v174_v27  ;;  %v177_v58 = vsel %vm175_vm6, %v174_v27, %v172_v10 }
  0xae   :  { %v186_v9 = vmul.f32 %v184_v61, %v176_v57  ;;  %v187_v11 = vmul.f32 %v185_v62, %v177_v58 }
  0xb0   :  { %v188_v20 = vadd.f32 %v186_v9, %v169_v17  ;;  %v189_v21 = vadd.f32 %v187_v11, %v170_v18  ;;  %v251_v9 = vld [vmem:[%s1361_s3 + $0x8] sm:$0xff] }
  0xb2   :  { %v199_v63 = vpop.permute.xlu1 %198 }
  0xb3   :  { %v203_v47 = vmul.f32 %v1052_v40, %v199_v63  ;;  %v204_v6 = vmul.f32 %v1057_v37, %v199_v63 }
  0xb4   :  { %v193_v12 = vpop.permute.xlu0 %192 }
  0xb5   :  { %v195_v10 = vsel %vm194_vm7, %v191_v1, %v193_v12  ;;  %v196_v16 = vsel %vm194_vm7, %v193_v12, %v191_v1 }
  0xb6   :  { %v205_v15 = vmul.f32 %v203_v47, %v195_v10  ;;  %v206_v19 = vmul.f32 %v204_v6, %v196_v16 }
  0xb8   :  { %v207_v22 = vadd.f32 %v205_v15, %v188_v20  ;;  %v208_v23 = vadd.f32 %v206_v19, %v189_v21 }
  0xbb   :  { %v212_v24 = vpop.permute.xlu1 %211 }
  0xbc   :  { %v214_v27 = vadd.f32 %v212_v24, %v207_v22  ;;  %v215_v28 = vadd.f32 %v212_v24, %v208_v23  ;;  %v244_v62 = vpop.permute.xlu0 %243  ;;  %v267_v24 = vpop.permute.xlu2 %266 }
  0xbe   :  { %v218_v29 = vmul.f32 0.044715, %v214_v27  ;;  %v219_v30 = vmul.f32 0.044715, %v215_v28  ;;  %v216_v43 = vmul.f32 0.5, %v214_v27  ;;  %v217_v54 = vmul.f32 0.5, %v215_v28 }
  0xc0   :  { %v220_v31 = vmul.f32 %v218_v29, %v214_v27  ;;  %v221_v32 = vmul.f32 %v219_v30, %v215_v28 }
  0xc2   :  { %v222_v33 = vmul.f32 %v220_v31, %v214_v27  ;;  %v223_v34 = vmul.f32 %v221_v32, %v215_v28 }
  0xc3   :  { %v272_v10 = vpop.permute.xlu1 %271 }
  0xc4   :  { %v224_v36 = vadd.f32 %v222_v33, %v214_v27  ;;  %v225_v48 = vadd.f32 %v223_v34, %v215_v28  ;;  %v262_v16 = vpop.permute.xlu0 %261 }
  0xc6   :  { %v226_v35 = vmul.f32 0.7978846, %v224_v36  ;;  %v227_v49 = vmul.f32 0.7978846, %v225_v48 }
  0xc8   :  { %795 = vtanh.f32 %v226_v35 }
  0xc9   :  { %797 = vtanh.f32 %v227_v49 }
  0xcb   :  { %v257_v21 = vpop.permute.xlu1 %256 }
  0xce   :  { %v796_v50 = vpop.eup %795 }
  0xcf   :  { %v798_v51 = vpop.eup %797  ;;  %v230_v52 = vadd.f32 1.0, %v796_v50 }
  0xd0   :  { %v231_v57 = vadd.f32 1.0, %v798_v51 }
  0xd1   :  { %v232_v58 = vmul.f32 %v230_v52, %v216_v43 }
  0xd2   :  { %v233_v60 = vmul.f32 %v231_v57, %v217_v54 }
  0xd3   :  { %v239_v61 = vmul.f32 %v237_v59, %v232_v58 }
  0xd4   :  { %v240_v63 = vmul.f32 %v237_v59, %v233_v60 }
  0xd5   :  { %v246_v1 = vadd.f32 %v244_v62, %v239_v61 }
  0xd6   :  { %v247_v47 = vadd.f32 %v244_v62, %v240_v63 }
  0xd7   :  { %v248_v6 = vadd.f32 %v246_v1, %v894_v5  ;;  %v252_v5 = vld [vmem:[%s1361_s3 + $0x10] sm:$0xff] }
  0xd8   :  { %v249_v8 = vadd.f32 %v247_v47, %v887_v2  ;;  %v253_v2 = vld [vmem:[%s1361_s3 + $0x18] sm:$0xff] }
  0xd9   :  { %302 = vmatpush.msra.mxu0 %v248_v6 }
  0xda   :  { %331 = vmatpush.msra.mxu1 %v249_v8  ;;  %751 = vmatmul.msk.f32.vlgmr.msra.gmra.mxu0 %vm274_vm8, %v250_v7 }
  0xdb   :  { %755 = vmatmul.msk.f32.vlgmr.msra.gmra.mxu1 %vm274_vm8, %v250_v7 }
  0xe2   :  { %752 = vmatmul.msk.f32.gmra.mxu0 %vm274_vm8, %v251_v9 }
  0xe3   :  { %756 = vmatmul.msk.f32.gmra.mxu1 %vm274_vm8, %v251_v9 }
  0xea   :  { %753 = vmatmul.msk.f32.gmra.mxu0 %vm274_vm8, %v252_v5 }
  0xeb   :  { %757 = vmatmul.msk.f32.gmra.mxu1 %vm274_vm8, %v252_v5 }
  0xf2   :  { %754 = vmatmul.msk.f32.gmra.mxu0 %vm274_vm8, %v253_v2 }
  0xf3   :  { %758 = vmatmul.msk.f32.gmra.mxu1 %vm274_vm8, %v253_v2 }
 0x157   :  { %v304_v11 = vpop.f32.mrf.mxu0 }
 0x158   :  { %v333_v12 = vpop.f32.mrf.mxu1  ;;  %v1100_v23 = vadd.f32 %v304_v11, %v257_v21 }
 0x159   :  { %v1102_v27 = vadd.f32 %v333_v12, %v257_v21 }
 0x15a   :  { %v353_v36 = vmul.f32 0.044715, %v1100_v23 }
 0x15b   :  { %v354_v35 = vmul.f32 0.044715, %v1102_v27 }
 0x15c   :  { %v361_v54 = vmul.f32 %v353_v36, %v1100_v23 }
 0x15d   :  { %v362_v59 = vmul.f32 %v354_v35, %v1102_v27 }
 0x15e   :  { %v369_v7 = vmul.f32 %v361_v54, %v1100_v23 }
 0x15f   :  { %v307_v17 = vpop.f32.mrf.mxu0  ;;  %v370_v5 = vmul.f32 %v362_v59, %v1102_v27 }
 0x160   :  { %v1094_v18 = vadd.f32 %v307_v17, %v262_v16  ;;  %v336_v15 = vpop.f32.mrf.mxu1 }
 0x161   :  { %v1096_v19 = vadd.f32 %v336_v15, %v262_v16 }
 0x162   :  { %v355_v20 = vmul.f32 0.044715, %v1094_v18 }
 0x163   :  { %v356_v22 = vmul.f32 0.044715, %v1096_v19 }
 0x164   :  { %v363_v31 = vmul.f32 %v355_v20, %v1094_v18 }
 0x165   :  { %v364_v33 = vmul.f32 %v356_v22, %v1096_v19  ;;  %v378_v22 = vadd.f32 %v370_v5, %v1102_v27 }
 0x166   :  { %v371_v50 = vmul.f32 %v363_v31, %v1094_v18 }
 0x167   :  { %v310_v28 = vpop.f32.mrf.mxu0  ;;  %v372_v43 = vmul.f32 %v364_v33, %v1096_v19 }
 0x168   :  { %v1104_v29 = vadd.f32 %v310_v28, %v267_v24  ;;  %v339_v30 = vpop.f32.mrf.mxu1  ;;  %v379_v62 = vadd.f32 %v371_v50, %v1094_v18 }
 0x169   :  { %v1107_v32 = vadd.f32 %v339_v30, %v267_v24  ;;  %v380_v1 = vadd.f32 %v372_v43, %v1096_v19 }
 0x16a   :  { %v357_v34 = vmul.f32 0.044715, %v1104_v29  ;;  %v387_v11 = vmul.f32 0.7978846, %v379_v62 }
 0x16b   :  { %v358_v48 = vmul.f32 0.044715, %v1107_v32  ;;  %v388_v16 = vmul.f32 0.7978846, %v380_v1 }
 0x16c   :  { %v365_v49 = vmul.f32 %v357_v34, %v1104_v29  ;;  %799 = vtanh.f32 %v387_v11  ;;  %v386_v34 = vmul.f32 0.7978846, %v378_v22 }
 0x16d   :  { %v366_v51 = vmul.f32 %v358_v48, %v1107_v32  ;;  %801 = vtanh.f32 %v388_v16 }
 0x16e   :  { %v373_v52 = vmul.f32 %v365_v49, %v1104_v29 }
 0x16f   :  { %v313_v57 = vpop.f32.mrf.mxu0  ;;  %v374_v58 = vmul.f32 %v366_v51, %v1107_v32 }
 0x170   :  { %v314_v60 = vadd.f32 %v313_v57, %v272_v10  ;;  %v342_v61 = vpop.f32.mrf.mxu1  ;;  %v381_v6 = vadd.f32 %v373_v52, %v1104_v29 }
 0x171   :  { %v343_v63 = vadd.f32 %v342_v61, %v272_v10  ;;  %v382_v9 = vadd.f32 %v374_v58, %v1107_v32  ;;  %v377_v10 = vadd.f32 %v369_v7, %v1100_v23 }
 0x172   :  { %v359_v47 = vmul.f32 0.044715, %v314_v60  ;;  %v389_v15 = vmul.f32 0.7978846, %v381_v6  ;;  %v800_v36 = vpop.eup %799  ;;  %v351_v43 = vmul.f32 0.5, %v314_v60 }
 0x173   :  { %v360_v8 = vmul.f32 0.044715, %v343_v63  ;;  %v390_v21 = vmul.f32 0.7978846, %v382_v9  ;;  %v385_v31 = vmul.f32 0.7978846, %v377_v10  ;;  %v802_v48 = vpop.eup %801 }
 0x174   :  { %v367_v2 = vmul.f32 %v359_v47, %v314_v60  ;;  %803 = vtanh.f32 %v389_v15  ;;  %v352_v58 = vmul.f32 0.5, %v343_v63  ;;  %v349_v47 = vmul.f32 0.5, %v1104_v29 }
 0x175   :  { %v368_v12 = vmul.f32 %v360_v8, %v343_v63  ;;  %805 = vtanh.f32 %v390_v21  ;;  %v403_v6 = vadd.f32 1.0, %v800_v36  ;;  %v350_v8 = vmul.f32 0.5, %v1107_v32 }
 0x176   :  { %v375_v17 = vmul.f32 %v367_v2, %v314_v60  ;;  %v404_v9 = vadd.f32 1.0, %v802_v48  ;;  %v347_v2 = vmul.f32 0.5, %v1094_v18  ;;  %v346_v15 = vmul.f32 0.5, %v1102_v27  ;;  %v417_v18 = vld [vmem:[%s1362_s4] sm:$0xff] }
 0x177   :  { %v376_v20 = vmul.f32 %v368_v12, %v343_v63 }
 0x178   :  { %v383_v24 = vadd.f32 %v375_v17, %v314_v60  ;;  %v411_v16 = vmul.f32 %v403_v6, %v347_v2  ;;  %v345_v17 = vmul.f32 0.5, %v1100_v23 }
 0x179   :  { %v384_v28 = vadd.f32 %v376_v20, %v343_v63  ;;  %v348_v63 = vmul.f32 0.5, %v1096_v19  ;;  %v421_v19 = vpop.permute.xlu2 %420 }
 0x17a   :  { %v391_v30 = vmul.f32 0.7978846, %v383_v24  ;;  %v804_v35 = vpop.eup %803 }
 0x17b   :  { %v392_v33 = vmul.f32 0.7978846, %v384_v28  ;;  %v806_v49 = vpop.eup %805  ;;  %v405_v54 = vadd.f32 1.0, %v804_v35  ;;  %v412_v29 = vmul.f32 %v404_v9, %v348_v63 }
 0x17c   :  { %807 = vtanh.f32 %v391_v30  ;;  %v406_v61 = vadd.f32 1.0, %v806_v49 }
 0x17d   :  { %809 = vtanh.f32 %v392_v33  ;;  %v413_v5 = vmul.f32 %v405_v54, %v349_v47 }
 0x17e   :  { %811 = vtanh.f32 %v385_v31  ;;  %v414_v11 = vmul.f32 %v406_v61, %v350_v8  ;;  %v46_v8 = vld [vmem:[%s1360_s7 + $0x50] sm:$0xff] }
 0x17f   :  { %813 = vtanh.f32 %v386_v34 }
 0x182   :  { %v808_v50 = vpop.eup %807 }
 0x183   :  { %v810_v51 = vpop.eup %809  ;;  %v407_v52 = vadd.f32 1.0, %v808_v50 }
 0x184   :  { %v812_v57 = vpop.eup %811  ;;  %v408_v59 = vadd.f32 1.0, %v810_v51 }
 0x185   :  { %v814_v62 = vpop.eup %813  ;;  %v415_v1 = vmul.f32 %v407_v52, %v351_v43  ;;  %v401_v60 = vadd.f32 1.0, %v812_v57 }
 0x186   :  { %v416_v7 = vmul.f32 %v408_v59, %v352_v58  ;;  %v402_v12 = vadd.f32 1.0, %v814_v62  ;;  %v488_v58 = vpop.permute.xlu0 %487  ;;  %v495_v62 = vpop.permute.xlu1 %494 }
 0x187   :  { %439 = vmatpush.msra.mxu2 %v415_v1  ;;  %v409_v32 = vmul.f32 %v401_v60, %v345_v17 }
 0x188   :  { %459 = vmatpush.msra.mxu3 %v416_v7  ;;  %v410_v10 = vmul.f32 %v402_v12, %v346_v15  ;;  %v47_v7 = vld [vmem:[%s1360_s7 + $0x58] sm:$0xff] }
 0x189   :  { %440 = vmatpush.msra.mxu2 %v413_v5 }
 0x18a   :  { %460 = vmatpush.msra.mxu3 %v414_v11 }
 0x18b   :  { %441 = vmatpush.msra.mxu2 %v411_v16 }
 0x18c   :  { %461 = vmatpush.msra.mxu3 %v412_v29 }
 0x18d   :  { %442 = vmatpush.msra.mxu2 %v409_v32 }
 0x18e   :  { %462 = vmatpush.msra.mxu3 %v410_v10  ;;  %759 = vmatmul.msk.f32.vlgmr.msra.gmra.mxu2 %vm423_vm9, %v417_v18 }
 0x18f   :  { %760 = vmatmul.msk.f32.vlgmr.msra.gmra.mxu3 %vm423_vm9, %v417_v18 }
 0x211   :  { %v444_v20 = vpop.f32.mrf.mxu2 }
 0x212   :  { %v445_v23 = vadd.f32 %v444_v20, %v421_v19  ;;  %v464_v21 = vpop.f32.mrf.mxu3 }
 0x213   :  { %v465_v22 = vadd.f32 %v464_v21, %v421_v19  ;;  %v669_v21 = vld [vmem:[%s1363_s6 + $0x78] sm:$0xff] }
 0x214   :  { %v469_v24 = vmul.f32 0.044715, %v445_v23  ;;  %v467_v51 = vmul.f32 0.5, %v445_v23  ;;  %696 = vmatpush.msrb.mxu0 %v669_v21 }
 0x215   :  { %v470_v27 = vmul.f32 0.044715, %v465_v22  ;;  %v468_v52 = vmul.f32 0.5, %v465_v22 }
 0x216   :  { %v471_v28 = vmul.f32 %v469_v24, %v445_v23  ;;  %v685_v24 = vld [vmem:[%s1363_s6 + $0xf8] sm:$0xff] }
 0x217   :  { %v472_v30 = vmul.f32 %v470_v27, %v465_v22  ;;  %719 = vmatpush.msrb.mxu1 %v685_v24 }
 0x218   :  { %v473_v31 = vmul.f32 %v471_v28, %v445_v23 }
 0x219   :  { %v474_v33 = vmul.f32 %v472_v30, %v465_v22 }
 0x21a   :  { %v475_v34 = vadd.f32 %v473_v31, %v445_v23 }
 0x21b   :  { %v476_v36 = vadd.f32 %v474_v33, %v465_v22  ;;  %v668_v22 = vld [vmem:[%s1363_s6 + $0x70] sm:$0xff]  ;;  %v667_v33 = vld [vmem:[%s1363_s6 + $0x68] sm:$0xff] }
 0x21c   :  { %v477_v48 = vmul.f32 0.7978846, %v475_v34  ;;  %697 = vmatpush.msrb.mxu0 %v668_v22  ;;  %v683_v34 = vld [vmem:[%s1363_s6 + $0xe8] sm:$0xff] }
 0x21d   :  { %v478_v35 = vmul.f32 0.7978846, %v476_v36 }
 0x21e   :  { %815 = vtanh.f32 %v477_v48  ;;  %698 = vmatpush.msrb.mxu0 %v667_v33 }
 0x21f   :  { %817 = vtanh.f32 %v478_v35 }
 0x224   :  { %v816_v49 = vpop.eup %815 }
 0x225   :  { %v818_v50 = vpop.eup %817  ;;  %v481_v43 = vadd.f32 1.0, %v816_v49 }
 0x226   :  { %v482_v54 = vadd.f32 1.0, %v818_v50 }
 0x227   :  { %v483_v57 = vmul.f32 %v481_v43, %v467_v51  ;;  %v665_v51 = vld [vmem:[%s1363_s6 + $0x58] sm:$0xff] }
 0x228   :  { %v484_v59 = vmul.f32 %v482_v54, %v468_v52  ;;  %v681_v43 = vld [vmem:[%s1363_s6 + $0xd8] sm:$0xff] }
 0x229   :  { %v490_v61 = vmul.f32 %v488_v58, %v483_v57 }
 0x22a   :  { %v491_v1 = vmul.f32 %v488_v58, %v484_v59 }
 0x22b   :  { %v1139_v47 = vadd.f32 %v495_v62, %v490_v61 }
 0x22c   :  { %v1141_v6 = vadd.f32 %v495_v62, %v491_v1  ;;  %v663_v62 = vld [vmem:[%s1363_s6 + $0x48] sm:$0xff] }
 0x22d   :  { %561 = vrot.lane.b32.xlu1 %v1139_v47, %s832_s15  ;;  %571 = vrot.lane.b32.xlu2 %v1139_v47, %s834_s16  ;;  %v679_v1 = vld [vmem:[%s1363_s6 + $0xc8] sm:$0xff] }
 0x22e   :  { %573 = vrot.lane.b32.xlu0 %v1141_v6, %s834_s16 }
 0x235   :  { %553 = vrot.lane.b32.xlu1 %v1141_v6, %s830_s14  ;;  %563 = vrot.lane.b32.xlu2 %v1141_v6, %s832_s15 }
 0x236   :  { %551 = vrot.lane.b32.xlu0 %v1139_v47, %s830_s14 }
 0x23d   :  { %529 = vrot.lane.b32.xlu1 %v1139_v47, %s827_s0  ;;  %541 = vrot.lane.b32.xlu2 %v1139_v47, %s829_s13 }
 0x23e   :  { %543 = vrot.lane.b32.xlu0 %v1141_v6, %s829_s13 }
 0x245   :  { %521 = vrot.lane.b32.xlu1 %v1141_v6, %s825_s12  ;;  %531 = vrot.lane.b32.xlu2 %v1141_v6, %s827_s0 }
 0x246   :  { %519 = vrot.lane.b32.xlu0 %v1139_v47, %s825_s12 }
 0x24d   :  { %499 = vrot.lane.b32.xlu1 %v1139_v47, %s821_s9  ;;  %509 = vrot.lane.b32.xlu2 %v1139_v47, %s823_s1 }
 0x24e   :  { %511 = vrot.lane.b32.xlu0 %v1141_v6, %s823_s1 }
 0x255   :  { %693 = vperm.xlu1 %791, %v47_v7   ;;  %501 = vrot.lane.b32.xlu2 %v1141_v6, %s821_s9  ;;  %v677_v7 = vld [vmem:[%s1363_s6 + $0xb8] sm:$0xff] }
 0x256   :  { %688 = vperm.xlu0 %782, %v46_v8  }
 0x287   :  { %v572_v9 = vpop.permute.xlu2 %571 }
 0x28f   :  { %v564_v5 = vpop.permute.xlu2 %563 }
 0x297   :  { %v542_v17 = vpop.permute.xlu2 %541 }
 0x29f   :  { %v562_v2 = vpop.permute.xlu1 %561 }
 0x2a0   :  { %v574_v60 = vpop.permute.xlu0 %573  ;;  %v565_v12 = vsel %vm175_vm6, %v562_v2, %v564_v5  ;;  %v566_v16 = vsel %vm175_vm6, %v564_v5, %v562_v2  ;;  %v660_v5 = vld [vmem:[%s1363_s6 + $0x30] sm:$0xff] }
 0x2a1   :  { %v575_v11 = vsel %vm194_vm7, %v572_v9, %v574_v60  ;;  %v576_v63 = vsel %vm194_vm7, %v574_v60, %v572_v9  ;;  %v567_v32 = vmul.f32 %v565_v12, %v182_v25  ;;  %v568_v18 = vmul.f32 %v566_v16, %v183_v26  ;;  %v532_v25 = vpop.permute.xlu2 %531 }
 0x2a2   :  { %v577_v29 = vmul.f32 %v1052_v40, %v575_v11  ;;  %v578_v15 = vmul.f32 %v1057_v37, %v576_v63 }
 0x2a4   :  { %615 = vmatpush.msrb.mxu2 %v577_v29  ;;  %638 = vmatpush.msrb.mxu3 %v578_v15  ;;  %v676_v29 = vld [vmem:[%s1363_s6 + $0xb0] sm:$0xff]  ;;  %v658_v15 = vld [vmem:[%s1363_s6 + $0x20] sm:$0xff] }
 0x2a6   :  { %616 = vmatpush.msrb.mxu2 %v567_v32  ;;  %639 = vmatpush.msrb.mxu3 %v568_v18  ;;  %v675_v32 = vld [vmem:[%s1363_s6 + $0xa8] sm:$0xff] }
 0x2a7   :  { %v554_v10 = vpop.permute.xlu1 %553  ;;  %v655_v18 = vld [vmem:[%s1363_s6 + $0x8] sm:$0xff] }
 0x2a8   :  { %v552_v19 = vpop.permute.xlu0 %551 }
 0x2a9   :  { %v555_v20 = vsel %vm156_vm5, %v552_v19, %v554_v10  ;;  %v556_v40 = vsel %vm156_vm5, %v554_v10, %v552_v19  ;;  %v510_v35 = vpop.permute.xlu2 %509  ;;  %v672_v10 = vld [vmem:[%s1363_s6 + $0x90] sm:$0xff]  ;;  %v582_v19 = vld [vmem:[%s1364_s5 + $0x8] sm:$0xff] }
 0x2aa   :  { %v557_v37 = vmul.f32 %v555_v20, %v163_v13  ;;  %v558_v23 = vmul.f32 %v556_v40, %v164_v14  ;;  %v684_v14 = vld [vmem:[%s1363_s6 + $0xf0] sm:$0xff]  ;;  %v654_v20 = vld [vmem:[%s1363_s6] sm:$0xff]  ;;  %v671_v40 = vld [vmem:[%s1363_s6 + $0x88] sm:$0xff] }
 0x2ab   :  { %720 = vmatpush.msrb.mxu1 %v684_v14 }
 0x2ac   :  { %617 = vmatpush.msrb.mxu2 %v557_v37  ;;  %640 = vmatpush.msrb.mxu3 %v558_v23  ;;  %v670_v37 = vld [vmem:[%s1363_s6 + $0x80] sm:$0xff] }
 0x2ad   :  { %721 = vmatpush.msrb.mxu1 %v683_v34 }
 0x2af   :  { %v530_v26 = vpop.permute.xlu1 %529 }
 0x2b0   :  { %v544_v13 = vpop.permute.xlu0 %543  ;;  %v533_v36 = vsel %vm118_vm3, %v530_v26, %v532_v25  ;;  %v534_v48 = vsel %vm118_vm3, %v532_v25, %v530_v26 }
 0x2b1   :  { %v545_v27 = vsel %vm137_vm4, %v542_v17, %v544_v13  ;;  %v546_v28 = vsel %vm137_vm4, %v544_v13, %v542_v17  ;;  %v535_v49 = vmul.f32 %v534_v48, %v125_v56  ;;  %v536_v50 = vmul.f32 %v533_v36, %v126_v0  ;;  %v664_v56 = vld [vmem:[%s1363_s6 + $0x50] sm:$0xff]  ;;  %v502_v8 = vpop.permute.xlu2 %501  ;;  %v659_v17 = vld [vmem:[%s1363_s6 + $0x28] sm:$0xff] }
 0x2b2   :  { %v547_v30 = vmul.f32 %v545_v27, %v144_v3  ;;  %v548_v31 = vmul.f32 %v546_v28, %v145_v4  ;;  %v666_v3 = vld [vmem:[%s1363_s6 + $0x60] sm:$0xff]  ;;  %v680_v0 = vld [vmem:[%s1363_s6 + $0xd0] sm:$0xff] }
 0x2b3   :  { %v682_v4 = vld [vmem:[%s1363_s6 + $0xe0] sm:$0xff]  ;;  %699 = vmatpush.msrb.mxu0 %v666_v3 }
 0x2b4   :  { %618 = vmatpush.msrb.mxu2 %v547_v30  ;;  %641 = vmatpush.msrb.mxu3 %v548_v31 }
 0x2b5   :  { %722 = vmatpush.msrb.mxu1 %v682_v4  ;;  %700 = vmatpush.msrb.mxu0 %v665_v51 }
 0x2b6   :  { %619 = vmatpush.msrb.mxu2 %v1139_v47  ;;  %642 = vmatpush.msrb.mxu3 %v1141_v6  ;;  %v662_v47 = vld [vmem:[%s1363_s6 + $0x40] sm:$0xff] }
 0x2b7   :  { %v522_v52 = vpop.permute.xlu1 %521  ;;  %723 = vmatpush.msrb.mxu1 %v681_v43  ;;  %701 = vmatpush.msrb.mxu0 %v664_v56 }
 0x2b8   :  { %v520_v54 = vpop.permute.xlu0 %519  ;;  %620 = vmatpush.msrb.mxu2 %v535_v49  ;;  %643 = vmatpush.msrb.mxu3 %v536_v50 }
 0x2b9   :  { %v523_v57 = vsel %vm99_vm2, %v520_v54, %v522_v52  ;;  %v524_v58 = vsel %vm99_vm2, %v522_v52, %v520_v54  ;;  %724 = vmatpush.msrb.mxu1 %v680_v0  ;;  %702 = vmatpush.msrb.mxu0 %v663_v62 }
 0x2ba   :  { %v525_v59 = vmul.f32 %v524_v58, %v106_v53  ;;  %v526_v61 = vmul.f32 %v523_v57, %v107_v55  ;;  %v678_v53 = vld [vmem:[%s1363_s6 + $0xc0] sm:$0xff]  ;;  %v661_v55 = vld [vmem:[%s1363_s6 + $0x38] sm:$0xff] }
 0x2bb   :  { %725 = vmatpush.msrb.mxu1 %v679_v1  ;;  %703 = vmatpush.msrb.mxu0 %v662_v47 }
 0x2bc   :  { %621 = vmatpush.msrb.mxu2 %v525_v59  ;;  %644 = vmatpush.msrb.mxu3 %v526_v61 }
 0x2bd   :  { %726 = vmatpush.msrb.mxu1 %v678_v53  ;;  %704 = vmatpush.msrb.mxu0 %v661_v55 }
 0x2bf   :  { %v500_v6 = vpop.permute.xlu1 %499  ;;  %727 = vmatpush.msrb.mxu1 %v677_v7  ;;  %705 = vmatpush.msrb.mxu0 %v660_v5 }
 0x2c0   :  { %v512_v9 = vpop.permute.xlu0 %511  ;;  %v503_v11 = vsel %vm61_vm0, %v500_v6, %v502_v8  ;;  %v504_v63 = vsel %vm61_vm0, %v502_v8, %v500_v6 }
 0x2c1   :  { %v513_v2 = vsel %vm80_vm1, %v510_v35, %v512_v9  ;;  %v514_v60 = vsel %vm80_vm1, %v512_v9, %v510_v35  ;;  %v505_v38 = vmul.f32 %v504_v63, %v68_v44  ;;  %706 = vmatpush.msrb.mxu0 %v659_v17  ;;  %728 = vmatpush.msrb.mxu1 %v676_v29  ;;  %v656_v44 = vld [vmem:[%s1363_s6 + $0x10] sm:$0xff] }
 0x2c2   :  { %v515_v12 = vmul.f32 %v514_v60, %v87_v42  ;;  %v516_v16 = vmul.f32 %v513_v2, %v88_v45  ;;  %v506_v42 = vmul.f32 %v503_v11, %v69_v46  ;;  %v581_v45 = vld [vmem:[%s1364_s5] sm:$0xff]  ;;  %v673_v46 = vld [vmem:[%s1363_s6 + $0x98] sm:$0xff] }
 0x2c3   :  { %707 = vmatpush.msrb.mxu0 %v658_v15  ;;  %729 = vmatpush.msrb.mxu1 %v675_v32 }
 0x2c4   :  { %622 = vmatpush.msrb.mxu2 %v515_v12  ;;  %645 = vmatpush.msrb.mxu3 %v516_v16 }
 0x2c5   :  { %708 = vmatpush.msrb.mxu0 %v657_v39  ;;  %730 = vmatpush.msrb.mxu1 %v674_v41 }
 0x2c6   :  { %623 = vmatpush.msrb.mxu2 %v505_v38  ;;  %646 = vmatpush.msrb.mxu3 %v506_v42 }
 0x2c7   :  { %761 = vmatmul.msk.f32.vlgmr.msrb.gmra.mxu2 %vm601_vm10, %v581_v45  ;;  %763 = vmatmul.msk.f32.vlgmr.msrb.gmra.mxu3 %vm601_vm10, %v581_v45  ;;  %v694_v30 = vpop.permute.xlu1 %693 }
 0x2c8   :  { %709 = vmatpush.msrb.mxu0 %v656_v44  ;;  %731 = vmatpush.msrb.mxu1 %v673_v46  ;;  %v689_v22 = vpop.permute.xlu0 %688 }
 0x2ca   :  { %710 = vmatpush.msrb.mxu0 %v655_v18  ;;  %732 = vmatpush.msrb.mxu1 %v672_v10 }
 0x2cc   :  { %711 = vmatpush.msrb.mxu0 %v654_v20  ;;  %733 = vmatpush.msrb.mxu1 %v671_v40 }
 0x2ce   :  { %734 = vmatpush.msrb.mxu1 %v670_v37 }
 0x2cf   :  { %762 = vmatmul.msk.f32.gmra.mxu2 %vm601_vm10, %v582_v19  ;;  %764 = vmatmul.msk.f32.gmra.mxu3 %vm601_vm10, %v582_v19 }
 0x34a   :  { %v625_v23 = vpop.f32.mrf.mxu2  ;;  %v648_v25 = vpop.f32.mrf.mxu3 }
 0x34b   :  { %712 = vmatmul.f32.vlgmr.msrb.gmra.mxu0 %v625_v23  ;;  %735 = vmatmul.f32.vlgmr.msrb.gmra.mxu1 %v648_v25 }
 0x352   :  { %v628_v26 = vpop.f32.mrf.mxu2  ;;  %v651_v21 = vpop.f32.mrf.mxu3 }
 0x353   :  { %715 = vmatmul.f32.gmra.mxu0 %v628_v26  ;;  %738 = vmatmul.f32.gmra.mxu1 %v651_v21 }
 0x3c8   :  { %v713_v24 = vpop.f32.mrf.mxu0  ;;  %v736_v13 = vpop.f32.mrf.mxu1 }
 0x3c9   :  { %v714_v14 = vadd.f32 %v713_v24, %v689_v22 }
 0x3cb   :  { %v737_v27 = vadd.f32 %v736_v13, %v714_v14 }
 0x3cd   :  { %v742_v28 = vmax.f32 %v737_v27, 0.0 }
 0x3cf   :  { %745 = vst.msk [vmem:[%s1365_s8] sm:$0xff] %vm744_vm11, %v742_v28 }
 0x3d0   :  { %v716_v31 = vpop.f32.mrf.mxu0  ;;  %v739_v33 = vpop.f32.mrf.mxu1 }
 0x3d1   :  { %v717_v34 = vadd.f32 %v716_v31, %v694_v30 }
 0x3d3   :  { %v740_v36 = vadd.f32 %v739_v33, %v717_v34 }
 0x3d5   :  { %v743_v48 = vmax.f32 %v740_v36, 0.0 }
 0x3d7   :  { %746 = vst.msk [vmem:[%s1365_s8 + $0x8] sm:$0xff] %vm744_vm11, %v743_v48 }

</bundles_post_ra>
